<compile_context>
chip_gen: v5e
topology: v5e:2x2
jax: 0.10.0
libtpu: 0.0.40
codegen_flags: <defaults>
</compile_context>

<pallas_src>
import functools
import math

import jax
import jax.numpy as jnp
from jax.experimental import pallas as pl
from jax.experimental.pallas import tpu as pltpu


_VMEM_LIMIT = 48 * 1024 * 1024  # > default scoped limits, < v7x 64 MiB physical


def _round_up(x, m):
    return (x + m - 1) // m * m


# ----------------------------------------------------------------------------
# Pallas MXU matmul: bf16 operands, f32 accumulation, (near-)collapsed K axis
# ----------------------------------------------------------------------------

_K_CAP = 2304  # largest single-shot K tile; (256+256)*2304*2B*2buf ~= 4.7 MiB


def _k_plan(K):
    """Return (Kp, tk, nk): K zero-padded to Kp = tk*nk, tk multiple of 128."""
    if K <= _K_CAP:
        tk = _round_up(K, 128)
        return tk, tk, 1
    nk = -(-K // _K_CAP)                       # ceil
    tk = _round_up(-(-K // nk), 128)
    return tk * nk, tk, nk


def _pick_mn_tiles(M, N):
    # N (lane) tile: 256 feeds the 256x256 MXU on v6e/v7x; v5e splits it fine.
    if N >= 256:
        tn = 256
    elif N >= 128:
        tn = 128
    else:
        tn = N
    n_blocks = pl.cdiv(N, tn)

    # M (sublane) tile: multiples of 16 (bf16 packs 16 sublanes per vreg).
    if M >= 512:
        tm = 256
    elif M >= 256:
        tm = 128
    elif M >= 64 and n_blocks == 1:
        # guarantee >=2 "parallel" blocks so v7x's second TensorCore has work
        tm = _round_up((M + 1) // 2, 16)
    else:
        tm = M  # single full-extent block (always a legal block shape)
    return tm, tn


def _matmul_kernel_single(a_ref, b_ref, o_ref):
    # Full-K block: no accumulator scratch, no init/finalize branches.
    o_ref[...] = jnp.dot(a_ref[...], b_ref[...],
                         preferred_element_type=jnp.float32).astype(o_ref.dtype)


def _matmul_kernel_acc(a_ref, b_ref, o_ref, acc_ref):
    @pl.when(pl.program_id(2) == 0)
    def _():
        acc_ref[...] = jnp.zeros_like(acc_ref)

    acc_ref[...] += jnp.dot(a_ref[...], b_ref[...],
                            preferred_element_type=jnp.float32)

    @pl.when(pl.program_id(2) == pl.num_programs(2) - 1)
    def _():
        o_ref[...] = acc_ref[...].astype(o_ref.dtype)


def pallas_matmul(a, b, out_dtype=jnp.float32):
    """(M, K) @ (K, N) -> (M, N). bf16 on the MXU, f32 accumulation.

    Only K is zero-padded (clipping alone along K would feed garbage into the
    reduction).  M / N edge blocks are clipped by Pallas.
    """
    M, K = a.shape
    K2, N = b.shape
    assert K == K2
    Kp, tk, nk = _k_plan(K)

    if a.dtype != jnp.bfloat16:
        a = a.astype(jnp.bfloat16)
    if b.dtype != jnp.bfloat16:
        b = b.astype(jnp.bfloat16)
    if Kp != K:
        a = jnp.pad(a, ((0, 0), (0, Kp - K)))
        b = jnp.pad(b, ((0, Kp - K), (0, 0)))

    tm, tn = _pick_mn_tiles(M, N)

    if nk == 1:
        return pl.pallas_call(
            _matmul_kernel_single,
            out_shape=jax.ShapeDtypeStruct((M, N), out_dtype),
            grid_spec=pltpu.PrefetchScalarGridSpec(
                num_scalar_prefetch=0,
                grid=(pl.cdiv(M, tm), pl.cdiv(N, tn)),
                in_specs=[
                    pl.BlockSpec((tm, Kp), lambda i, j: (i, 0)),
                    pl.BlockSpec((Kp, tn), lambda i, j: (0, j)),
                ],
                out_specs=pl.BlockSpec((tm, tn), lambda i, j: (i, j)),
            ),
            compiler_params=pltpu.CompilerParams(
                dimension_semantics=("parallel", "parallel"),
                vmem_limit_bytes=_VMEM_LIMIT),
        )(a, b)

    return pl.pallas_call(
        _matmul_kernel_acc,
        out_shape=jax.ShapeDtypeStruct((M, N), out_dtype),
        grid_spec=pltpu.PrefetchScalarGridSpec(
            num_scalar_prefetch=0,
            grid=(pl.cdiv(M, tm), pl.cdiv(N, tn), nk),
            in_specs=[
                pl.BlockSpec((tm, tk), lambda i, j, k: (i, k)),
                pl.BlockSpec((tk, tn), lambda i, j, k: (k, j)),
            ],
            out_specs=pl.BlockSpec((tm, tn), lambda i, j, k: (i, j)),
            scratch_shapes=[pltpu.VMEM((tm, tn), jnp.float32)],
        ),
        compiler_params=pltpu.CompilerParams(
            dimension_semantics=("parallel", "parallel", "arbitrary"),
            vmem_limit_bytes=_VMEM_LIMIT),
    )(a, b)


# ----------------------------------------------------------------------------
# Row-tiled two-pass BatchNorm (batch stats, affine=False) + residual + ReLU
#   pass 1: per-channel sum / sum-of-squares accumulated over row chunks
#   pass 2: normalize row chunks (+ optional residual add, + optional ReLU)
# Channel axis on lanes; row chunks stream through VMEM (<= 1024 rows/block).
# ----------------------------------------------------------------------------

def _bn_stats_kernel(x_ref, sums_ref, *, rows, tr):
    r = pl.program_id(1)
    x = x_ref[...].astype(jnp.float32)
    if rows % tr != 0:
        # mask the clipped edge block out of the reduction
        ridx = jax.lax.broadcasted_iota(jnp.int32, x.shape, 0) + r * tr
        x = jnp.where(ridx < rows, x, 0.0)
    part = jnp.concatenate(
        [jnp.sum(x, axis=0, keepdims=True),
         jnp.sum(x * x, axis=0, keepdims=True)], axis=0)     # (2, tc)

    @pl.when(r == 0)
    def _():
        sums_ref[...] = part

    @pl.when(r != 0)
    def _():
        sums_ref[...] += part


def _bn_norm_kernel(x_ref, stats_ref, o_ref, *, inv_n, relu, eps):
    x = x_ref[...].astype(jnp.float32)
    m = stats_ref[0:1, :] * inv_n
    v = stats_ref[1:2, :] * inv_n - m * m
    y = (x - m) * jax.lax.rsqrt(jnp.maximum(v, 0.0) + eps)
    if relu:
        y = jnp.maximum(y, 0.0)
    o_ref[...] = y.astype(o_ref.dtype)


def _bn_norm_res_kernel(x_ref, stats_ref, res_ref, o_ref, *, inv_n, relu, eps):
    x = x_ref[...].astype(jnp.float32)
    m = stats_ref[0:1, :] * inv_n
    v = stats_ref[1:2, :] * inv_n - m * m
    y = (x - m) * jax.lax.rsqrt(jnp.maximum(v, 0.0) + eps)
    y = y + res_ref[...].astype(jnp.float32)
    if relu:
        y = jnp.maximum(y, 0.0)
    o_ref[...] = y.astype(o_ref.dtype)


def batchnorm_act(x2d, residual2d=None, relu=True, eps=1e-5,
                  out_dtype=jnp.bfloat16):
    """x2d: (N*H*W, C) bf16 conv output. Returns BN(+res)(+ReLU) in bf16."""
    rows, C = x2d.shape

    # channel (lane) tile: 256-wide for the big layers, exact divisor of C
    if C >= 256:
        tc = 256
    elif C >= 128:
        tc = 128
    else:
        tc = C
    nc = pl.cdiv(C, tc)

    # row (sublane) tile: stream rows so blocks never balloon past VMEM
    tr = rows if rows <= 1024 else 1024
    nr = pl.cdiv(rows, tr)

    x_block = pl.BlockSpec((tr, tc), lambda c, r: (r, c))
    stats_block = pl.BlockSpec((2, tc), lambda c, r: (0, c))

    # ---- pass 1: per-channel sum / sumsq ----
    stats = pl.pallas_call(
        functools.partial(_bn_stats_kernel, rows=rows, tr=tr),
        out_shape=jax.ShapeDtypeStruct((2, C), jnp.float32),
        grid_spec=pltpu.PrefetchScalarGridSpec(
            num_scalar_prefetch=0,
            grid=(nc, nr),
            in_specs=[x_block],
            out_specs=stats_block,
        ),
        compiler_params=pltpu.CompilerParams(
            dimension_semantics=("parallel", "arbitrary"),
            vmem_limit_bytes=_VMEM_LIMIT),
    )(x2d)

    # ---- pass 2: normalize (+ residual) (+ ReLU) ----
    inv_n = 1.0 / float(rows)
    if residual2d is None:
        kernel = functools.partial(_bn_norm_kernel, inv_n=inv_n, relu=relu,
                                   eps=eps)
        in_specs = [x_block, stats_block]
        operands = (x2d, stats)
    else:
        kernel = functools.partial(_bn_norm_res_kernel, inv_n=inv_n, relu=relu,
                                   eps=eps)
        in_specs = [x_block, stats_block,
                    pl.BlockSpec((tr, tc), lambda c, r: (r, c))]
        operands = (x2d, stats, residual2d)

    # TODO(synk): for C=64 (stem/layer1) a lane-dense (rows/2, 128) reshape of
    # the normalize pass would avoid half-empty vst.msk stores; row tiling
    # already overlaps them with DMA, so it is left for a later pass.
    return pl.pallas_call(
        kernel,
        out_shape=jax.ShapeDtypeStruct((rows, C), out_dtype),
        grid_spec=pltpu.PrefetchScalarGridSpec(
            num_scalar_prefetch=0,
            grid=(nc, nr),
            in_specs=in_specs,
            out_specs=pl.BlockSpec((tr, tc), lambda c, r: (r, c)),
        ),
        compiler_params=pltpu.CompilerParams(
            dimension_semantics=("parallel", "parallel"),
            vmem_limit_bytes=_VMEM_LIMIT),
    )(*operands)


# ----------------------------------------------------------------------------
# Conv / pool wrappers
# ----------------------------------------------------------------------------

def _im2col_bf16(x_nhwc, kh, kw, stride, pad, k_pad_to):
    """Extract conv patches -> (N*OH*OW, k_pad_to) bf16 slab; trailing zero
    K-padding is folded into the single concatenate (no extra pad copy)."""
    N, H, W, C = x_nhwc.shape
    OH = (H + 2 * pad - kh) // stride + 1
    OW = (W + 2 * pad - kw) // stride + 1
    xp = x_nhwc.astype(jnp.bfloat16)
    if pad:
        xp = jnp.pad(xp, ((0, 0), (pad, pad), (pad, pad), (0, 0)))
    cols = []
    for i in range(kh):
        for j in range(kw):
            cols.append(xp[:, i:i + stride * OH:stride,
                           j:j + stride * OW:stride, :])
    K = kh * kw * C
    if k_pad_to > K:
        cols.append(jnp.zeros((N, OH, OW, k_pad_to - K), jnp.bfloat16))
    patches = jnp.concatenate(cols, axis=-1) if len(cols) > 1 else cols[0]
    # TODO(synk): a tap-accumulating conv (9-tap in-kernel window gather) would
    # remove the remaining kh*kw HBM amplification of this slab; kept as im2col
    # for lowering robustness since strided in-kernel window slices are the
    # main Mosaic risk at these shapes.
    return patches.reshape(N * OH * OW, k_pad_to), N, OH, OW


def conv2d(x_nhwc, w_oihw, *, stride, pad):
    """PyTorch-semantics Conv2d; weight is (O, Cin, kh, kw). Output bf16 2-D."""
    O, Cin, kh, kw = w_oihw.shape
    K = kh * kw * Cin
    Kp, _, _ = _k_plan(K)
    cols, N, OH, OW = _im2col_bf16(x_nhwc, kh, kw, stride, pad, Kp)
    wm = jnp.transpose(w_oihw, (2, 3, 1, 0)).reshape(K, O).astype(jnp.bfloat16)
    if Kp > K:
        wm = jnp.pad(wm, ((0, Kp - K), (0, 0)))
    # bf16 writeback: halves conv->BN HBM traffic; BN stats tolerate bf16.
    y2d = pallas_matmul(cols, wm, out_dtype=jnp.bfloat16)   # (N*OH*OW, O)
    return y2d, (N, OH, OW, O)


def maxpool2d_3x3_s2_p1(x_nhwc):
    # Fused XLA strided-slice max tree: no 9x tap stack through HBM.
    N, H, W, C = x_nhwc.shape
    s, k, p = 2, 3, 1
    OH = (H + 2 * p - k) // s + 1
    OW = (W + 2 * p - k) // s + 1
    neg = jnp.finfo(x_nhwc.dtype).min
    xp = jnp.pad(x_nhwc, ((0, 0), (p, p), (p, p), (0, 0)), constant_values=neg)
    out = None
    for i in range(k):
        for j in range(k):
            tap = xp[:, i:i + s * OH:s, j:j + s * OW:s, :]
            out = tap if out is None else jnp.maximum(out, tap)
    return out


# ----------------------------------------------------------------------------
# ResNet-18 (meta-learning variant) forward
# ----------------------------------------------------------------------------

def basic_block(x_nhwc, p, stride):
    # out = relu(bn2(conv2(relu(bn1(conv1(x))))) + downsample(x))
    y2d, oshape = conv2d(x_nhwc, p['conv1_w'], stride=stride, pad=1)
    out = batchnorm_act(y2d, relu=True).reshape(oshape)

    y2d, oshape = conv2d(out, p['conv2_w'], stride=1, pad=1)

    if 'ds_w' in p:
        id2d, _ = conv2d(x_nhwc, p['ds_w'], stride=stride, pad=0)
        identity2d = batchnorm_act(id2d, relu=False)
    else:
        N, H, W, C = x_nhwc.shape
        identity2d = x_nhwc.reshape(N * H * W, C)

    out2d = batchnorm_act(y2d, residual2d=identity2d, relu=True)
    return out2d.reshape(oshape)


def resnet18_forward(params, x_nchw):
    # layout: input NCHW (PyTorch), internal NHWC (bf16 activations).
    x = jnp.transpose(x_nchw.astype(jnp.float32), (0, 2, 3, 1))

    # stem: conv1 (3x3, s2, p3, bias) -> bn1 -> relu -> maxpool.
    # NOTE: the conv1 bias is *exactly* cancelled by the affine-free
    # batch-stat bn1 (per-channel shift drops out of the mean subtraction),
    # so it is not applied -- saves a full-slab add + an extra HBM pass.
    y2d, shape = conv2d(x, params['conv1_w'], stride=2, pad=3)
    x = batchnorm_act(y2d, relu=True).reshape(shape)
    x = maxpool2d_3x3_s2_p1(x)

    for layer in ('layer1', 'layer2', 'layer3', 'layer4'):
        for bi, bp in enumerate(params[layer]):
            stride = 2 if (layer != 'layer1' and bi == 0) else 1
            x = basic_block(x, bp, stride)

    feat = jnp.mean(x.astype(jnp.float32), axis=(1, 2))   # avgpool + flatten
    if params.get('fc_w') is not None:
        feat = pallas_matmul(feat, params['fc_w'].T) + params['fc_b'][None, :]
    # fc = Identity when dim_output is None -> (N, 512) features
    return feat


# ----------------------------------------------------------------------------
# Deterministic synthetic parameter init (shapes from the module's __init__)
# ----------------------------------------------------------------------------

def init_params(key, input_channel=3, dim_output=None, bn_affine=False):
    keys = iter(jax.random.split(key, 64))

    def conv_w(o, i, kh, kw):
        fan = i * kh * kw
        return (jax.random.normal(next(keys), (o, i, kh, kw), jnp.float32)
                / math.sqrt(fan))

    params = {
        'conv1_w': conv_w(64, input_channel, 3, 3),
        # bias=not bn_affine -> present for bn_affine=False (unused in forward:
        # exact no-op under the batch-stat affine-free bn1 that follows)
        'conv1_b': (0.01 * jax.random.normal(next(keys), (64,), jnp.float32))
                   if not bn_affine else None,
    }
    # TODO(synk): bn_affine=True (learnable gamma/beta) not implemented; the
    # module default bn_affine=False has no BN parameters at all.

    def block(cin, cout, stride):
        p = {'conv1_w': conv_w(cout, cin, 3, 3),
             'conv2_w': conv_w(cout, cout, 3, 3)}
        if stride != 1 or cin != cout:
            p['ds_w'] = conv_w(cout, cin, 1, 1)
        return p

    params['layer1'] = [block(64, 64, 1), block(64, 64, 1)]
    params['layer2'] = [block(64, 128, 2), block(128, 128, 1)]
    params['layer3'] = [block(128, 256, 2), block(256, 256, 1)]
    params['layer4'] = [block(256, 512, 2), block(512, 512, 1)]

    if dim_output is not None:
        params['fc_w'] = (jax.random.normal(next(keys), (dim_output, 512),
                                            jnp.float32) / math.sqrt(512.0))
        params['fc_b'] = jnp.zeros((dim_output,), jnp.float32)
    else:
        params['fc_w'] = None
        params['fc_b'] = None
    return params


if __name__ == "__main__":
    key = jax.random.PRNGKey(0)
    pkey, xkey = jax.random.split(key)

    input_channel = 3
    params = init_params(pkey, input_channel=input_channel, dim_output=None)

    # small input consistent with the module: NCHW, batch=2, C=3, 16x16
    x = jax.random.normal(xkey, (2, input_channel, 16, 16), jnp.float32)

    out = resnet18_forward(params, x)
    out = jax.block_until_ready(out)

    assert out.shape == (2, 512), out.shape          # fc=Identity -> features
    assert bool(jnp.all(jnp.isfinite(out)))
    print("KERNEL_OK")
</pallas_src>

<mosaic_0001>
module attributes {stable_mosaic.version = 11 : i64} {
  func.func @_matmul_kernel_single(%arg0: i32, %arg1: i32, %arg2: memref<112x128xbf16, #tpu.memory_space<vmem>>, %arg3: memref<128x64xbf16, #tpu.memory_space<vmem>>, %arg4: memref<112x64xbf16, #tpu.memory_space<vmem>>) attributes {dimension_semantics = [#tpu.dimension_semantics<parallel>, #tpu.dimension_semantics<parallel>], iteration_bounds = array<i64: 2, 1>, scalar_prefetch = 0 : i64, scratch_operands = 0 : i64, tpu.core_type = #tpu.core_type<tc>, window_params = [{transform_indices = @transform_0, window_bounds = array<i64: 112, 128>}, {transform_indices = @transform_1, window_bounds = array<i64: 128, 64>}, {transform_indices = @transform_2, window_bounds = array<i64: 112, 64>}]} {
    %c0 = arith.constant 0 : index
    %c0_0 = arith.constant 0 : index
    %0 = vector.load %arg2[%c0, %c0_0] : memref<112x128xbf16, #tpu.memory_space<vmem>>, vector<112x128xbf16>
    %c0_1 = arith.constant 0 : index
    %c0_2 = arith.constant 0 : index
    %1 = vector.load %arg3[%c0_1, %c0_2] : memref<128x64xbf16, #tpu.memory_space<vmem>>, vector<128x64xbf16>
    %cst = arith.constant dense<0.000000e+00> : vector<112x64xf32>
    %2 = tpu.matmul %0, %1, %cst {dimension_numbers = #tpu.dot_dimension_numbers<[1], [0], [0], [1], [0, 0, 1, 1], [], []>} : vector<112x128xbf16>, vector<128x64xbf16>, vector<112x64xf32> -> vector<112x64xf32>
    %3 = arith.truncf %2 : vector<112x64xf32> to vector<112x64xbf16>
    %c0_3 = arith.constant 0 : index
    %c0_4 = arith.constant 0 : index
    %4 = vector.load %arg4[%c0_3, %c0_4] : memref<112x64xbf16, #tpu.memory_space<vmem>>, vector<112x64xbf16>
    tpu.vector_store %arg4[%c0_3, %c0_4], %3 {strides = array<i32>} : memref<112x64xbf16, #tpu.memory_space<vmem>>, vector<112x64xbf16>,
    return
  }
  func.func @transform_0(%arg0: i32, %arg1: i32) -> (i32, i32) {
    %c0_i32 = arith.constant 0 : i32
    %c0_i32_0 = arith.constant 0 : i32
    return %arg0, %c0_i32 : i32, i32
  }
  func.func @transform_1(%arg0: i32, %arg1: i32) -> (i32, i32) {
    %c0_i32 = arith.constant 0 : i32
    %c0_i32_0 = arith.constant 0 : i32
    return %c0_i32, %arg1 : i32, i32
  }
  func.func @transform_2(%arg0: i32, %arg1: i32) -> (i32, i32) {
    %c0_i32 = arith.constant 0 : i32
    return %arg0, %arg1 : i32, i32
  }
}

</mosaic_0001>

<bundles_post_ra>
// kernel: tpu_custom_call.1
= control target key start
LH: loop header
LB: loop body
LE: loop exit
PB: predicated region body
PF: predicated region fallthrough
CT: control target
= control target key end

     0   :  { %7 = vsyncpa [#allocation3], 0  ;;  %s1399_s0 = inlined_call_operand.hbm [shape: bf16[200,128], index: 0, kind: input, shape index: {}]   ;;  %s1400_s1 = inlined_call_operand.vmem [shape: bf16[128,64], index: 1, kind: input, shape index: {}]   ;;  %s1401_s2 = inlined_call_operand.vmem [shape: bf16[200,64], index: 2, kind: output, shape index: {}]  }
   0x1   :  { %9 = vsyncpa [#allocation3 + $0x1], 0  ;;  %s1129_s9 = smov 0   ;;  %s1131_s10 = smov 0  }
   0x2   :  { %s1133_s11 = smov 0   ;;  %s1135_s12 = smov 0  }
   0x3   :  { %s1137_s13 = smov 0   ;;  %s1139_s14 = smov 0  }
   0x4 LB: > { %s708_s15 = sadd.s32 4294967295, %s1077_s14   ;;  %s27_s16 = sadd.s32 1, %s1073_s13  ;;  %s1077_s14 = sphi %s1139_s14, %s15_s14   ;;  %s1073_s13 = sphi %s1137_s13, %s1414_s13   ;;  %s1069_s12 = sphi %s1135_s12, %s1413_s12   ;;  %s1065_s11 = sphi %s1133_s11, %s1412_s11   ;;  %s1061_s10 = sphi %s1131_s10, %s1411_s10   ;;  %s1057_s9 = sphi %s1129_s9, %s1410_s9  }
   0x5   : > { %p29_p0 = scmp.ge.s32.totalorder %s27_s16, 2  ;;  %s34_s17 = sadd.s32 1, %s1065_s11 }
   0x6   : > { %p41_p1 = scmp.ne.s32.totalorder %s1065_s11, %s1061_s10  ;;  %p42_p2 = scmp.eq.s32.totalorder %s1077_s14, 0 }
   0x7   : > { %s1416_s16 = smov (%p29_p0, %s27_s16), 0  ;;  %p47_p4 = scmp.ne.s32.totalorder %s1061_s10, %s1057_s9 }
   0x8   : > { %p43_p3 = por %p42_p2, %p41_p1  ;;  %s31_s18 = ssub.s32 %s1073_s13, %s1416_s16 }
   0x9   : > { %p48_p5 = scmp.eq.s32.totalorder %s708_s15, 0  ;;  %p32_p6 = scmp.eq.s32.totalorder %s31_s18, 0 }
   0xa   : > { %p99_p7 = scmp.eq.s32.totalorder %s708_s15, 1  ;;  %p712_p10 = scmp.ge.s32.totalorder %s1077_s14, 2 }
   0xb   : > { %p1168_p8 = por %p48_p5, %p47_p4 }
   0xc   : > { %s1173_s20 = scalar_select %p32_p6, %s1065_s11, %s34_s17  }
   0xd   : > { %p1175_p9 = por %p99_p7, %p41_p1  ;;  %128 = sbr.rel (%p712_p10) target bundleno = 56 (0x38), region = 20 }
  0x12   : > { %131 = sbr.rel (!%p43_p3) target bundleno = 56 (0x38), region = 24  ;;  %s132_s22 = sand.u32 (%p43_p3), 1, %s1065_s11  }
  0x13   : > { %s137_s23 = smul.u32 (%p43_p3), 14, %s1073_s13  ;;  %s1185_s29 = scalar_lea.sflag (%p43_p3), [#allocation3], %s132_s22 }
  0x14   : > { %s832_s24 = smul.u32 (%p43_p3), 56, %s132_s22 }
  0x15   : > { %s138_s25 = ssub.s32 (%p43_p3), 25, %s137_s23 }
  0x16   : > { %p139_p11 = scmp.lt.s32.totalorder (%p43_p3), %s138_s25, 14  ;;  %s136_s30 = scalar_lea.vmem (%p43_p3), [#allocation2], %s832_s24 }
  0x18   : > { %s1418_s25 = smov (!%p139_p11, %s138_s25), 14 }
  0x19   : > { %s713_s26 = sshll.u32 %s1418_s25, 2 }
  0x1a   : > { %s142_s27 = ssub.s32 56, %s713_s26 }
  0x1b   : > { %s143_s28 = sshll.u32 %s142_s27, 4 }
  0x1c   : > { %144 = vsyncadd %s1185_s29, %s143_s28  ;;  %p1188_p12 = scmp.ne.s32.totalorder %s713_s26, 0  ;;  %s791_s4 = smul.u32 56, %s1073_s13 }
  0x1d   : > { %s1193_s5 = sshll.u32 %s136_s30, 4  ;;  %s717_s6 = sshll.u32 %s1418_s25, 6  ;;  %s152_s5 = int_to_ptr.vmem [resolvable:$true] %s1193_s5 }
  0x1e   : > { %s147_s9 = scalar_lea.hbm %s1399_s0, %s791_s4  ;;  %s958_s18 = sshrl.u32 %s717_s6, 4 }
  0x1f   : > { %s149_s15 = sshll.u32 %s147_s9, 4  ;;  %s967_s26 = scalar_lea.hbm %s1399_s0, 100  ;;  %s1200_s15 = int_to_ptr.hbm [resolvable:$true] %s149_s15 }
  0x20   : > { %s956_s17 = sshra.s32 %s1200_s15, 4  ;;  %s957_s17 = int_to_ptr.hbm [resolvable:$true] %s956_s17 }
  0x21   : > { %s963_s22 = scalar_lea.hbm %s957_s17, %s958_s18 }
  0x22   : > { %p964_p13 = scmp.ne.s32.totalorder %s957_s17, %s963_s22  ;;  %p969_p2 = scmp.lt.s32.totalorder %s967_s26, %s963_s22 }
  0x24   : > { %p965_p0 = pnand %p964_p13, %p1188_p12 }
  0x26   : > { %p966_p1 = pneg %p965_p0 }
  0x28   : > { %p971_p3 = pnand %p969_p2, %p966_p1 }
  0x2a   : > { %974 = shalt.err (!%p971_p3)
}
  0x2b   : > { %s975_s27 = sshra.s32 %s152_s5, 4  ;;  %s1111_s30 = smov [#allocation2]   ;;  %s976_s27 = int_to_ptr.vmem [resolvable:$true] %s975_s27 }
  0x2c   : > { %s982_s28 = scalar_lea.vmem %s976_s27, %s958_s18  ;;  %s986_s4 = scalar_lea.vmem %s1111_s30, 112 }
  0x2d   : > { %p983_p4 = scmp.ne.s32.totalorder %s976_s27, %s982_s28  ;;  %p988_p7 = scmp.lt.s32.totalorder %s986_s4, %s982_s28 }
  0x2f   : > { %p984_p5 = pnand %p983_p4, %p1188_p12 }
  0x31   : > { %p985_p6 = pneg %p984_p5 }
  0x33   : > { %p990_p10 = pnand %p988_p7, %p985_p6 }
  0x35   : > { %993 = shalt.err (!%p990_p10)
}
  0x36   : > { %s1112_s7 = smov 64   ;;  %s1113_s8 = smov 4  }
  0x37   : > { %157 = dma.hbm_to_vmem [thread:$0]  (%p1188_p12), %s1200_s15, %s717_s6, %s152_s5, %s1185_s29, %s1112_s7, %s1112_s7, %s1113_s8  }
  0x38 PF: > { %p718_p11 = scmp.ge.s32.totalorder %s1077_s14, 1  ;;  %p159_p13 = scmp.lt.s32.totalorder %s1077_s14, 3 }
  0x3a   : > { %p160_p0 = pnand %p718_p11, %p159_p13 }
  0x3b   : > { %s165_s9 = sand.u32 (!%p160_p0), 1, %s1061_s10  }
  0x3c   : > { %163 = sbr.rel (%p160_p0) target bundleno = 319 (0x13f), region = 28  ;;  %s166_s18 = scalar_lea.sflag (!%p160_p0), [#allocation3], %s165_s9 }
  0x3d   : > { %s1225_s17 = smul.u32 (!%p160_p0), 56, %s165_s9 }
  0x3f   : > { %s1228_s22 = scalar_lea.vmem (!%p160_p0), [#allocation2], %s1225_s17 }
  0x41   : > { %1052 = dma.done.wait (%p1168_p8), %s166_s18, 896  }
  0x42   : > { %1054 = vsyncadd (%p1168_p8), %s166_s18, 4294966400  ;;  %v806_v0 = vld [vmem:[%s1400_s1 + $0x38] sm:$0xff]  ;;  %v805_v1 = vld [vmem:[%s1400_s1 + $0x30] sm:$0xff]  ;;  %vm386_vm0 = vcmask 519168   ;;  %s1266_s9 = scalar_lea.vmem [#allocation4], %s1225_s17   ;;  %s408_s17 = smul.u32 (%p1175_p9), 14, %s1069_s12 }
  0x43   : > { %808 = vmatpush.bf16.msra.mxu1 %v806_v0  ;;  %809 = vmatpush.bf16.msra.mxu2 %v806_v0  ;;  %v804_v2 = vld [vmem:[%s1400_s1 + $0x28] sm:$0xff]  ;;  %v803_v3 = vld [vmem:[%s1400_s1 + $0x20] sm:$0xff]  ;;  %v802_v4 = vld [vmem:[%s1400_s1 + $0x18] sm:$0xff]  ;;  %s807_s18 = smul.u32 (%p1175_p9), 56, %s1069_s12 }
  0x44   : > { %810 = vmatpush.bf16.msra.mxu3 %v806_v0  ;;  %328 = vmatpush.bf16.msra.mxu0 %v806_v0  ;;  %v801_v5 = vld [vmem:[%s1400_s1 + $0x10] sm:$0xff]  ;;  %v800_v6 = vld [vmem:[%s1400_s1 + $0x8] sm:$0xff]  ;;  %v799_v7 = vld [vmem:[%s1400_s1] sm:$0xff] }
  0x45   : > { %v793_v8 = vld [vmem:[%s1228_s22 + $0x8] sm:$0xff]  ;;  %v795_v9 = vld [vmem:[%s1228_s22 + $0x18] sm:$0xff]  ;;  %v792_v11 = vld [vmem:[%s1228_s22] sm:$0xff]  ;;  %s1303_s3 = scalar_lea.vmem (%p1175_p9), %s1401_s2, %s807_s18  }
  0x46   : > { %v797_v10 = vld [vmem:[%s1228_s22 + $0x28] sm:$0xff]  ;;  %v794_v12 = vld [vmem:[%s1228_s22 + $0x10] sm:$0xff]  ;;  %v796_v13 = vld [vmem:[%s1228_s22 + $0x20] sm:$0xff] }
  0x47   : > { %811 = vmatpush.bf16.msra.mxu1 %v805_v1  ;;  %812 = vmatpush.bf16.msra.mxu2 %v805_v1  ;;  %v798_v14 = vld [vmem:[%s1228_s22 + $0x30] sm:$0xff]  ;;  %s409_s22 = ssub.s32 (%p1175_p9), 25, %s408_s17 }
  0x48   : > { %813 = vmatpush.bf16.msra.mxu3 %v805_v1  ;;  %329 = vmatpush.bf16.msra.mxu0 %v805_v1  ;;  %p410_p8 = scmp.lt.s32.totalorder (%p1175_p9), %s409_s22, 14 }
  0x4b   : > { %814 = vmatpush.bf16.msra.mxu1 %v804_v2  ;;  %815 = vmatpush.bf16.msra.mxu2 %v804_v2 }
  0x4c   : > { %816 = vmatpush.bf16.msra.mxu3 %v804_v2  ;;  %330 = vmatpush.bf16.msra.mxu0 %v804_v2 }
  0x4f   : > { %817 = vmatpush.bf16.msra.mxu1 %v803_v3  ;;  %818 = vmatpush.bf16.msra.mxu2 %v803_v3 }
  0x50   : > { %819 = vmatpush.bf16.msra.mxu3 %v803_v3  ;;  %331 = vmatpush.bf16.msra.mxu0 %v803_v3 }
  0x53   : > { %820 = vmatpush.bf16.msra.mxu1 %v802_v4  ;;  %821 = vmatpush.bf16.msra.mxu2 %v802_v4 }
  0x54   : > { %822 = vmatpush.bf16.msra.mxu3 %v802_v4  ;;  %332 = vmatpush.bf16.msra.mxu0 %v802_v4 }
  0x57   : > { %823 = vmatpush.bf16.msra.mxu1 %v801_v5  ;;  %824 = vmatpush.bf16.msra.mxu2 %v801_v5 }
  0x58   : > { %825 = vmatpush.bf16.msra.mxu3 %v801_v5  ;;  %333 = vmatpush.bf16.msra.mxu0 %v801_v5 }
  0x5b   : > { %826 = vmatpush.bf16.msra.mxu1 %v800_v6  ;;  %827 = vmatpush.bf16.msra.mxu2 %v800_v6 }
  0x5c   : > { %828 = vmatpush.bf16.msra.mxu3 %v800_v6  ;;  %334 = vmatpush.bf16.msra.mxu0 %v800_v6 }
  0x5f   : > { %829 = vmatpush.bf16.msra.mxu1 %v799_v7  ;;  %830 = vmatpush.bf16.msra.mxu2 %v799_v7 }
  0x60   : > { %831 = vmatpush.bf16.msra.mxu3 %v799_v7  ;;  %335 = vmatpush.bf16.msra.mxu0 %v799_v7 }
  0x62   : > { %341 = vmatmul.bf16.vlgmr.msra.gmra.mxu1 %v793_v8  ;;  %351 = vmatmul.bf16.vlgmr.msra.gmra.mxu2 %v795_v9 }
  0x63   : > { %361 = vmatmul.bf16.vlgmr.msra.gmra.mxu3 %v797_v10  ;;  %336 = vmatmul.bf16.vlgmr.msra.gmra.mxu0 %v792_v11 }
  0x72   : > { %346 = vmatmul.bf16.gmra.mxu1 %v794_v12  ;;  %356 = vmatmul.bf16.gmra.mxu2 %v796_v13 }
  0x73   : > { %366 = vmatmul.bf16.gmra.mxu3 %v798_v14 }
  0xdf   : > { %v342_v15 = vpop.f32.mrf.mxu1 }
  0xe0   : > { %v374_v16 = vpack.c.bf16 %v342_v15, %v342_v15  ;;  %v337_v17 = vpop.f32.mrf.mxu0 }
  0xe1   : > { %v372_v18 = vpack.c.bf16 %v337_v17, %v337_v17 }
  0xe2   : > { %389 = vst.msk [vmem:[%s1266_s9 + $0x8] sm:$0xf] %vm386_vm0, %v374_v16 }
  0xe3   : > { %387 = vst.msk [vmem:[%s1266_s9] sm:$0xf] %vm386_vm0, %v372_v18 }
  0xe5   : > { %v352_v19 = vpop.f32.mrf.mxu2 }
  0xe6   : > { %v378_v20 = vpack.c.bf16 %v352_v19, %v352_v19  ;;  %v362_v21 = vpop.f32.mrf.mxu3 }
  0xe7   : > { %v382_v22 = vpack.c.bf16 %v362_v21, %v362_v21  ;;  %v344_v23 = vpop.f32.mrf.mxu1 }
  0xe8   : > { %393 = vst.msk [vmem:[%s1266_s9 + $0x18] sm:$0xf] %vm386_vm0, %v378_v20  ;;  %v375_v24 = vpack.c.bf16 %v344_v23, %v344_v23  ;;  %v339_v25 = vpop.f32.mrf.mxu0 }
  0xe9   : > { %397 = vst.msk [vmem:[%s1266_s9 + $0x28] sm:$0xf] %vm386_vm0, %v382_v22  ;;  %v373_v26 = vpack.c.bf16 %v339_v25, %v339_v25 }
  0xea   : > { %390 = vst.msk [vmem:[%s1266_s9 + $0xc] sm:$0xf] %vm386_vm0, %v375_v24 }
  0xeb   : > { %388 = vst.msk [vmem:[%s1266_s9 + $0x4] sm:$0xf] %vm386_vm0, %v373_v26 }
  0xed   : > { %v354_v27 = vpop.f32.mrf.mxu2 }
  0xee   : > { %v379_v28 = vpack.c.bf16 %v354_v27, %v354_v27  ;;  %v364_v29 = vpop.f32.mrf.mxu3 }
  0xef   : > { %v383_v30 = vpack.c.bf16 %v364_v29, %v364_v29  ;;  %v347_v31 = vpop.f32.mrf.mxu1 }
  0xf0   : > { %394 = vst.msk [vmem:[%s1266_s9 + $0x1c] sm:$0xf] %vm386_vm0, %v379_v28  ;;  %v376_v32 = vpack.c.bf16 %v347_v31, %v347_v31 }
  0xf1   : > { %398 = vst.msk [vmem:[%s1266_s9 + $0x2c] sm:$0xf] %vm386_vm0, %v383_v30 }
  0xf2   : > { %391 = vst.msk [vmem:[%s1266_s9 + $0x10] sm:$0xf] %vm386_vm0, %v376_v32 }
  0xf5   : > { %v357_v33 = vpop.f32.mrf.mxu2 }
  0xf6   : > { %v380_v34 = vpack.c.bf16 %v357_v33, %v357_v33  ;;  %v367_v35 = vpop.f32.mrf.mxu3 }
  0xf7   : > { %v384_v36 = vpack.c.bf16 %v367_v35, %v367_v35  ;;  %v349_v37 = vpop.f32.mrf.mxu1 }
  0xf8   : > { %395 = vst.msk [vmem:[%s1266_s9 + $0x20] sm:$0xf] %vm386_vm0, %v380_v34  ;;  %v377_v38 = vpack.c.bf16 %v349_v37, %v349_v37 }
  0xf9   : > { %399 = vst.msk [vmem:[%s1266_s9 + $0x30] sm:$0xf] %vm386_vm0, %v384_v36 }
  0xfa   : > { %392 = vst.msk [vmem:[%s1266_s9 + $0x14] sm:$0xf] %vm386_vm0, %v377_v38 }
  0xfd   : > { %v359_v39 = vpop.f32.mrf.mxu2  ;;  %407 = sbr.rel (!%p1175_p9) target bundleno = 319 (0x13f), region = 36 }
  0xfe   : > { %v381_v40 = vpack.c.bf16 %v359_v39, %v359_v39  ;;  %v369_v41 = vpop.f32.mrf.mxu3 }
  0xff   : > { %v385_v42 = vpack.c.bf16 %v369_v41, %v369_v41 }
 0x100   : > { %396 = vst.msk [vmem:[%s1266_s9 + $0x24] sm:$0xf] %vm386_vm0, %v381_v40 }
 0x101   : > { %400 = vst.msk [vmem:[%s1266_s9 + $0x34] sm:$0xf] %vm386_vm0, %v385_v42 }
 0x102   : > { %s1420_s22 = smov (!%p410_p8, %s409_s22), 14 }
 0x103   : > { %s779_s5 = sshll.u32 %s1420_s22, 2 }
 0x104   : > { %p782_p12 = scmp.eq.s32.totalorder %s779_s5, 0 }
 0x105   : > { %950 = sdivrem.u32 (!%p782_p12), %s1420_s22, 14 }
 0x106   : > { %419 = sbr.rel (%p782_p12) target bundleno = 319 (0x13f), region = 40 }
 0x10e   : > { %s1309_s21 = spop.drf %950 }
 0x10f   : > { %s952_s6 = spop.drf %950  ;;  %p783_p9 = scmp.le.s32.totalorder %s1309_s21, 0 }
 0x110   : > { %s1405_s12 = smov (!%p783_p9), %s1303_s3  ;;  %s1406_s15 = smov (!%p783_p9), %s1266_s9 }
 0x111   : > { %644 = sbr.rel (%p783_p9) target bundleno = 293 (0x125), region = 121  ;;  %s1318_s19 = smov (!%p783_p9), 0  }
 0x112   : > { %s1320_s23 = smov (!%p783_p9), 0  }
 0x116 LB: >> { %v437_v43 = vld [vmem:[%s1085_s15] sm:$0xf]  ;;  %v439_v44 = vld [vmem:[%s1085_s15 + $0x4] sm:$0xf]  ;;  %v441_v45 = vld [vmem:[%s1085_s15 + $0x8] sm:$0xf]  ;;  %s1093_s23 = sphi %s1320_s23, %s431_s23   ;;  %s1089_s19 = sphi %s1318_s19, %s1409_s19   ;;  %s1085_s15 = sphi %s1406_s15, %s1408_s15   ;;  %s1081_s12 = sphi %s1405_s12, %s1407_s12  }
 0x117   : >> { %438 = vst [vmem:[%s1081_s12] sm:$0xf] %v437_v43  ;;  %v443_v46 = vld [vmem:[%s1085_s15 + $0xc] sm:$0xf]  ;;  %s465_s24 = sadd.s32 1, %s1089_s19  ;;  %v445_v47 = vld [vmem:[%s1085_s15 + $0x10] sm:$0xf] }
 0x118   : >> { %440 = vst [vmem:[%s1081_s12 + $0x4] sm:$0xf] %v439_v44  ;;  %p466_p1 = scmp.ge.s32.totalorder %s465_s24, %s1309_s21  ;;  %v447_v48 = vld [vmem:[%s1085_s15 + $0x14] sm:$0xf]  ;;  %v449_v49 = vld [vmem:[%s1085_s15 + $0x18] sm:$0xf] }
 0x119   : >> { %442 = vst [vmem:[%s1081_s12 + $0x8] sm:$0xf] %v441_v45  ;;  %v451_v50 = vld [vmem:[%s1085_s15 + $0x1c] sm:$0xf]  ;;  %v453_v51 = vld [vmem:[%s1085_s15 + $0x20] sm:$0xf] }
 0x11a   : >> { %444 = vst [vmem:[%s1081_s12 + $0xc] sm:$0xf] %v443_v46  ;;  %s1422_s24 = smov (%p466_p1, %s465_s24), 0  ;;  %v455_v52 = vld [vmem:[%s1085_s15 + $0x24] sm:$0xf]  ;;  %s431_s23 = sadd.s32 1, %s1093_s23  }
 0x11b   : >> { %446 = vst [vmem:[%s1081_s12 + $0x10] sm:$0xf] %v445_v47  ;;  %v457_v53 = vld [vmem:[%s1085_s15 + $0x28] sm:$0xf]  ;;  %s468_s26 = smul.u32 56, %s1422_s24  ;;  %p430_p2 = scmp.ge.s32.totalorder %s431_s23, %s1309_s21 }
 0x11c   : >> { %448 = vst [vmem:[%s1081_s12 + $0x14] sm:$0xf] %v447_v48  ;;  %v459_v54 = vld [vmem:[%s1085_s15 + $0x2c] sm:$0xf]  ;;  %v461_v55 = vld [vmem:[%s1085_s15 + $0x30] sm:$0xf]  ;;  %s1409_s19 = smov %s1422_s24 }
 0x11d   : >> { %450 = vst [vmem:[%s1081_s12 + $0x18] sm:$0xf] %v449_v49  ;;  %s470_s27 = scalar_lea.vmem %s1266_s9, %s468_s26 [#allocation4]   ;;  %s471_s28 = scalar_lea.vmem %s1303_s3, %s468_s26   ;;  %v463_v56 = vld [vmem:[%s1085_s15 + $0x34] sm:$0xf] }
 0x11e   : >> { %452 = vst [vmem:[%s1081_s12 + $0x1c] sm:$0xf] %v451_v50  ;;  %s1408_s15 = smov %s470_s27 }
 0x11f   : >> { %454 = vst [vmem:[%s1081_s12 + $0x20] sm:$0xf] %v453_v51 }
 0x120   : >> { %456 = vst [vmem:[%s1081_s12 + $0x24] sm:$0xf] %v455_v52  ;;  %433 = sbr.rel (!%p430_p2) target bundleno = 278 (0x116), region = 127 }
 0x121   : >> { %458 = vst [vmem:[%s1081_s12 + $0x28] sm:$0xf] %v457_v53 }
 0x122   : >> { %460 = vst [vmem:[%s1081_s12 + $0x2c] sm:$0xf] %v459_v54 }
 0x123   : >> { %462 = vst [vmem:[%s1081_s12 + $0x30] sm:$0xf] %v461_v55 }
 0x124   : >> { %464 = vst [vmem:[%s1081_s12 + $0x34] sm:$0xf] %v463_v56  ;;  %s1407_s12 = smov %s471_s28 }
 0x125 PF: > { %953 = sdivrem.u32 %s1420_s22, 14 }
 0x126   : > { %s784_s30 = smul.u32 56, %s1309_s21 }
 0x128   : > { %s1376_s4 = scalar_lea.vmem %s1266_s9, %s784_s30 [#allocation4]   ;;  %s478_s7 = scalar_lea.vmem %s1303_s3, %s784_s30  }
 0x12e   : > { %s954_s8 = spop.drf %953 }
 0x12f   : > { %s955_s17 = spop.drf %953 }
 0x130   : > { %p786_p3 = scmp.le.s32.totalorder %s955_s17, 0 }
 0x131   : > { %s1095_s18 = smov (!%p786_p3), %s478_s7   ;;  %s1099_s25 = smov (!%p786_p3), %s1376_s4  }
 0x132   : > { %658 = sbr.rel (%p786_p3) target bundleno = 319 (0x13f), region = 132  ;;  %s1103_s29 = smov (!%p786_p3), 0  }
 0x133   : > { %s1107_s5 = smov (!%p786_p3), 0  }
 0x137 LB: >> { %v488_v57 = vld [vmem:[%s1101_s25] sm:$0xf]  ;;  %s490_s9 = sadd.s32 1, %s1105_s29  ;;  %s482_s5 = sadd.s32 1, %s1109_s5   ;;  %s1109_s5 = sphi %s1107_s5, %s482_s5   ;;  %s1105_s29 = sphi %s1103_s29, %s1104_s29   ;;  %s1101_s25 = sphi %s1099_s25, %s495_s25   ;;  %s1097_s18 = sphi %s1095_s18, %s496_s18  }
 0x138   : >> { %489 = vst [vmem:[%s1097_s18] sm:$0xf] %v488_v57  ;;  %p491_p4 = scmp.ge.s32.totalorder %s490_s9, %s955_s17  ;;  %p481_p5 = scmp.ge.s32.totalorder %s482_s5, %s955_s17 }
 0x13a   : >> { %s1424_s9 = smov (%p491_p4, %s490_s9), 0  ;;  %484 = sbr.rel (!%p481_p5) target bundleno = 311 (0x137), region = 138 }
 0x13b   : >> { %s787_s22 = sshll.u32 %s1424_s9, 2  ;;  %s1104_s29 = smov %s1424_s9  }
 0x13c   : >> { %s495_s25 = scalar_lea.vmem %s1376_s4, %s787_s22 [#allocation4]   ;;  %s496_s18 = scalar_lea.vmem %s478_s7, %s787_s22  }
 0x13f PF: > { %s15_s14 = sadd.s32 1, %s1077_s14   ;;  %s1410_s9 = smov %s1061_s10 }
 0x140   : > { %p12_p6 = scmp.ge.s32.totalorder %s15_s14, 4   ;;  %s1411_s10 = smov %s1065_s11 }
 0x141   : > { %s1412_s11 = smov %s1173_s20  ;;  %s1413_s12 = smov %s1073_s13 }
 0x142   : > { %s1414_s13 = smov %s1416_s16  ;;  %14 = sbr.rel (!%p12_p6) target bundleno = 4 (0x4), region = 149 }
 0x147   :  { %585 = vsyncpa [#allocation3], 1 }
 0x148   :  { %587 = vsyncpa [#allocation3 + $0x1], 1 }

</bundles_post_ra>
